<compile_context>
chip_gen: v7x
topology: tpu7x:2x2x1
jax: 0.10.0
libtpu: 0.0.40
codegen_flags: <defaults>
</compile_context>

<pallas_src>
import functools

import jax
import jax.numpy as jnp
from jax.experimental import pallas as pl
from jax.experimental.pallas import tpu as pltpu


def lr_kernel(x_ref, w_ref, b_ref, o_ref, acc_ref, *, T, tt):
    """One grid step over a (tb, F, tt) tile of x.

    x_ref:   (tb, F, tt) input tile in native dtype (upcast to f32 here)
    w_ref:   (1, F) f32 weight, already scaled by 1/T (VMEM, F on lanes)
    b_ref:   (1, 1) f32 bias (SMEM scalar)
    o_ref:   (1, tb) f32 output block (lane-dense: batch on lanes)
    acc_ref: (tb, F) f32 running time-sum accumulator (VMEM scratch)
    """
    t = pl.program_id(1)
    nt = pl.num_programs(1)

    @pl.when(t == 0)
    def _init():
        acc_ref[...] = jnp.zeros_like(acc_ref)

    x = x_ref[...].astype(jnp.float32)                      # (tb, F, tt)

    if T % tt != 0:  # static: mask the partial last time tile
        limit = T - t * tt
        col = jax.lax.broadcasted_iota(jnp.int32, x.shape, 2)
        x = jnp.where(col < limit, x, 0.0)

    # Running sum over time for this tile (lane reduction, overlapped with DMA
    # of the next tile by the BlockSpec pipeline).
    acc_ref[...] += jnp.sum(x, axis=-1)                     # (tb, F)

    @pl.when(t == nt - 1)
    def _finalize():
        # Weighted feature reduction: sum_f acc[b, f] * (w[f] / T)  + bias
        z = jnp.sum(acc_ref[...] * w_ref[...], axis=-1, keepdims=True)  # (tb, 1)
        z = z + b_ref[0, 0]
        y = 1.0 / (1.0 + jnp.exp(-z))                       # sigmoid (exp -> EUP)
        o_ref[...] = y.reshape(o_ref.shape).astype(o_ref.dtype)   # (1, tb) lane-dense


def _choose_tiles(B, F, T):
    """Pick (tb, tt) so tiles pipeline nicely and fit v5e/v6e/v7x VMEM."""
    f32 = 4  # size in f32 (the in-kernel compute dtype), conservative
    # Time tile: full T when small, else a multiple of 128 so a 128-row batch
    # tile stays a few MiB.
    if T <= 512:
        tt = T
    else:
        tt = 512
        while tt > 128 and 128 * F * tt * f32 > (8 << 20):
            tt //= 2
    # Batch tile: full B when small / when it fits, else a multiple of 128 so
    # the lane-dense (1, tb) output block stays aligned (partial blocks OK).
    target = 2 << 20
    per_row = F * tt * f32
    fit = max(1, target // per_row)
    if B <= 128 or fit >= B:
        tb = B
    else:
        tb = min(max(128, (fit // 128) * 128), 128 * ((B + 127) // 128))
    return tb, tt


def lr_forward(x, weight, bias):
    """x: (B, F, T) any float dtype; weight: (1, F); bias: (1,) -> (B, 1) f32."""
    B, F, T = x.shape
    itemsize = jnp.dtype(x.dtype).itemsize
    tb, tt = _choose_tiles(B, F, T)
    nb = (B + tb - 1) // tb
    nt = (T + tt - 1) // tt

    # Fold the 1/T of the mean into the weight; keep F on lanes.
    w_scaled = weight.reshape(1, F).astype(jnp.float32) * (1.0 / T)
    b_smem = bias.reshape(1, 1).astype(jnp.float32)

    x_tile_native = tb * F * tt * itemsize
    x_tile_f32 = tb * F * tt * 4
    vmem_limit = int(min(48 << 20,
                         max(16 << 20,
                             2 * x_tile_native + 3 * x_tile_f32 + (2 << 20))))

    out2d = pl.pallas_call(
        functools.partial(lr_kernel, T=T, tt=tt),
        out_shape=jax.ShapeDtypeStruct((1, B), jnp.float32),
        grid=(nb, nt),
        in_specs=[
            pl.BlockSpec((tb, F, tt), lambda b, t: (b, 0, t)),   # streamed x tile
            pl.BlockSpec((1, F), lambda b, t: (0, 0)),           # resident weight
            pl.BlockSpec(memory_space=pltpu.SMEM),               # scalar bias
        ],
        out_specs=pl.BlockSpec((1, tb), lambda b, t: (0, b)),    # lane-dense logits
        scratch_shapes=[pltpu.VMEM((tb, F), jnp.float32)],       # time-sum accumulator
        compiler_params=pltpu.CompilerParams(
            dimension_semantics=("parallel", "arbitrary"),
            vmem_limit_bytes=vmem_limit,
        ),
    )(x, w_scaled, b_smem)

    return out2d.reshape(B, 1)


def _reference(x, weight, bias):
    xf = x.astype(jnp.float32)
    m = jnp.mean(xf, axis=2)
    return jax.nn.sigmoid(m @ weight.astype(jnp.float32).T + bias.astype(jnp.float32))


if __name__ == "__main__":
    key = jax.random.PRNGKey(0)
    kx1, kw1, kb1, kx2, kx3, kw3, kb3 = jax.random.split(key, 7)

    # 1) Small shapes consistent with the module: batch=2, feature_size=4, time=8.
    B, F, T = 2, 4, 8
    x1 = jax.random.normal(kx1, (B, F, T), dtype=jnp.float32)
    w1 = jax.random.normal(kw1, (1, F), dtype=jnp.float32) * 0.1
    b1 = jax.random.normal(kb1, (1,), dtype=jnp.float32) * 0.1
    out1 = jax.block_until_ready(lr_forward(x1, w1, b1))
    assert out1.shape == (B, 1)
    assert jnp.allclose(out1, _reference(x1, w1, b1), atol=2e-5, rtol=2e-5)

    # 2) bf16 input (native-dtype DMA), multi-tile time axis with masked partial tile.
    B2, T2 = 4, 600
    x2 = jax.random.normal(kx2, (B2, F, T2), dtype=jnp.float32).astype(jnp.bfloat16)
    out2 = jax.block_until_ready(lr_forward(x2, w1, b1))
    assert out2.shape == (B2, 1)
    assert jnp.allclose(out2, _reference(x2, w1, b1), atol=1e-4, rtol=1e-4)

    # 3) Multi-block batch (partial last B block) + multi-block time axis.
    B3, F3, T3 = 300, 8, 640
    x3 = jax.random.normal(kx3, (B3, F3, T3), dtype=jnp.float32)
    w3 = jax.random.normal(kw3, (1, F3), dtype=jnp.float32) * 0.1
    b3 = jax.random.normal(kb3, (1,), dtype=jnp.float32) * 0.1
    out3 = jax.block_until_ready(lr_forward(x3, w3, b3))
    assert out3.shape == (B3, 1)
    assert jnp.allclose(out3, _reference(x3, w3, b3), atol=2e-5, rtol=2e-5)

    print("KERNEL_OK")
</pallas_src>

<mosaic_0001>
module attributes {stable_mosaic.version = 11 : i64} {
  func.func @lr_kernel(%arg0: i32, %arg1: i32, %arg2: memref<2x4x8xf32, #tpu.memory_space<vmem>>, %arg3: memref<1x4xf32, #tpu.memory_space<vmem>>, %arg4: memref<1x1xf32, #tpu.memory_space<smem>>, %arg5: memref<1x2xf32, #tpu.memory_space<vmem>>, %arg6: memref<2x4xf32, #tpu.memory_space<vmem>>) attributes {dimension_semantics = [#tpu.dimension_semantics<parallel>, #tpu.dimension_semantics<arbitrary>], iteration_bounds = array<i64: 1, 1>, scalar_prefetch = 0 : i64, scratch_operands = 1 : i64, tpu.core_type = #tpu.core_type<tc>, window_params = [{transform_indices = @transform_0, window_bounds = array<i64: 2, 4, 8>}, {pipeline_mode = #tpu.pipeline_mode<synchronous>, transform_indices = @transform_1, window_bounds = array<i64: 1, 4>}, {transform_indices = @transform_2, window_bounds = array<i64: 1, 1>}, {transform_indices = @transform_3, window_bounds = array<i64: 1, 2>}]} {
    %c0_i32 = arith.constant 0 : i32
    %0 = arith.cmpi eq, %arg1, %c0_i32 : i32
    %1 = arith.extui %0 : i1 to i32
    %c0_i32_0 = arith.constant 0 : i32
    %2 = arith.cmpi ne, %1, %c0_i32_0 : i32
    scf.if %2 {
      %cst_9 = arith.constant 0.000000e+00 : f32
      %11 = vector.broadcast %cst_9 : f32 to vector<2x4xf32>
      %c0_10 = arith.constant 0 : index
      %c0_11 = arith.constant 0 : index
      %12 = vector.load %arg6[%c0_10, %c0_11] : memref<2x4xf32, #tpu.memory_space<vmem>>, vector<2x4xf32>
      tpu.vector_store %arg6[%c0_10, %c0_11], %11 {strides = array<i32>} : memref<2x4xf32, #tpu.memory_space<vmem>>, vector<2x4xf32>,
    } else {
    }
    %c0 = arith.constant 0 : index
    %c0_1 = arith.constant 0 : index
    %c0_2 = arith.constant 0 : index
    %3 = vector.load %arg2[%c0, %c0_1, %c0_2] : memref<2x4x8xf32, #tpu.memory_space<vmem>>, vector<2x4x8xf32>
    %c0_3 = arith.constant 0 : index
    %c0_4 = arith.constant 0 : index
    %4 = vector.load %arg6[%c0_3, %c0_4] : memref<2x4xf32, #tpu.memory_space<vmem>>, vector<2x4xf32>
    %cst = arith.constant dense<0.000000e+00> : vector<2x4xf32>
    %5 = vector.multi_reduction <add>, %3, %cst [2] : vector<2x4x8xf32> to vector<2x4xf32>
    %6 = arith.addf %4, %5 : vector<2x4xf32>
    %c0_5 = arith.constant 0 : index
    %c0_6 = arith.constant 0 : index
    %7 = vector.load %arg6[%c0_5, %c0_6] : memref<2x4xf32, #tpu.memory_space<vmem>>, vector<2x4xf32>
    tpu.vector_store %arg6[%c0_5, %c0_6], %6 {strides = array<i32>} : memref<2x4xf32, #tpu.memory_space<vmem>>, vector<2x4xf32>,
    %c0_i32_7 = arith.constant 0 : i32
    %8 = arith.cmpi eq, %arg1, %c0_i32_7 : i32
    %9 = arith.extui %8 : i1 to i32
    %c0_i32_8 = arith.constant 0 : i32
    %10 = arith.cmpi ne, %9, %c0_i32_8 : i32
    scf.if %10 {
      %c0_9 = arith.constant 0 : index
      %c0_10 = arith.constant 0 : index
      %11 = vector.load %arg6[%c0_9, %c0_10] : memref<2x4xf32, #tpu.memory_space<vmem>>, vector<2x4xf32>
      %c0_11 = arith.constant 0 : index
      %c0_12 = arith.constant 0 : index
      %12 = vector.load %arg3[%c0_11, %c0_12] : memref<1x4xf32, #tpu.memory_space<vmem>>, vector<1x4xf32>
      %13 = vector.broadcast %12 : vector<1x4xf32> to vector<2x4xf32>
      %14 = arith.mulf %11, %13 : vector<2x4xf32>
      %cst_13 = arith.constant dense<0.000000e+00> : vector<2xf32>
      %15 = vector.multi_reduction <add>, %14, %cst_13 [1] : vector<2x4xf32> to vector<2xf32>
      %16 = vector.shape_cast %15 : vector<2xf32> to vector<2x1xf32>
      %c0_14 = arith.constant 0 : index
      %c0_15 = arith.constant 0 : index
      %17 = memref.load %arg4[%c0_14, %c0_15] : memref<1x1xf32, #tpu.memory_space<smem>>
      %18 = vector.broadcast %17 : f32 to vector<2x1xf32>
      %19 = arith.addf %16, %18 : vector<2x1xf32>
      %cst_16 = arith.constant 0.000000e+00 : f32
      %20 = vector.broadcast %cst_16 : f32 to vector<2x1xf32>
      %21 = arith.subf %20, %19 : vector<2x1xf32>
      %22 = math.exp %21 : vector<2x1xf32>
      %cst_17 = arith.constant 1.000000e+00 : f32
      %23 = vector.broadcast %cst_17 : f32 to vector<2x1xf32>
      %24 = arith.addf %23, %22 : vector<2x1xf32>
      %cst_18 = arith.constant 1.000000e+00 : f32
      %25 = vector.broadcast %cst_18 : f32 to vector<2x1xf32>
      %26 = arith.divf %25, %24 : vector<2x1xf32>
      %27 = vector.shape_cast %26 : vector<2x1xf32> to vector<1x2xf32>
      %c0_19 = arith.constant 0 : index
      %c0_20 = arith.constant 0 : index
      %28 = vector.load %arg5[%c0_19, %c0_20] : memref<1x2xf32, #tpu.memory_space<vmem>>, vector<1x2xf32>
      tpu.vector_store %arg5[%c0_19, %c0_20], %27 {strides = array<i32>} : memref<1x2xf32, #tpu.memory_space<vmem>>, vector<1x2xf32>,
    } else {
    }
    return
  }
  func.func @transform_0(%arg0: i32, %arg1: i32) -> (i32, i32, i32) {
    %c0_i32 = arith.constant 0 : i32
    %c0_i32_0 = arith.constant 0 : i32
    return %arg0, %c0_i32, %arg1 : i32, i32, i32
  }
  func.func @transform_1(%arg0: i32, %arg1: i32) -> (i32, i32) {
    %c0_i32 = arith.constant 0 : i32
    %c0_i32_0 = arith.constant 0 : i32
    %c0_i32_1 = arith.constant 0 : i32
    return %c0_i32, %c0_i32_0 : i32, i32
  }
  func.func @transform_2(%arg0: i32, %arg1: i32) -> (i32, i32) {
    %c0_i32 = arith.constant 0 : i32
    %c0_i32_0 = arith.constant 0 : i32
    %c0_i32_1 = arith.constant 0 : i32
    return %c0_i32, %c0_i32_0 : i32, i32
  }
  func.func @transform_3(%arg0: i32, %arg1: i32) -> (i32, i32) {
    %c0_i32 = arith.constant 0 : i32
    %c0_i32_0 = arith.constant 0 : i32
    return %c0_i32, %arg0 : i32, i32
  }
}

</mosaic_0001>

<bundles_post_ra>
// kernel: tpu_custom_call.1
= control target key start
LH: loop header
LB: loop body
LE: loop exit
PB: predicated region body
PF: predicated region fallthrough
CT: control target
= control target key end

     0   :  { %9 = vsyncpa [#allocation5], 0  ;;  %s227_s0 = inlined_call_operand.hbm [shape: f32[2,4,8], index: 0, kind: input, shape index: {}]   ;;  %s228_s1 = inlined_call_operand.vmem [shape: f32[1,4], index: 1, kind: input, shape index: {}]   ;;  %s229_s2 = inlined_call_operand.<no memory space> [shape: f32[1,1], index: 2, kind: input, shape index: {}]   ;;  %s230_s3 = inlined_call_operand.hbm [shape: f32[1,2], index: 3, kind: output, shape index: {}]  }
   0x1   :  { %10 = vsyncpa [#allocation6], 0  ;;  %s169_s12 = smov [#allocation4]   ;;  %s121_s16 = scalar_lea.hbm %s227_s0, 128 }
   0x2   :  { %s16_s13 = sshll.u32 %s169_s12, 4  ;;  %p122_p0 = scmp.ne.s32.totalorder %s227_s0, %s121_s16  ;;  %s17_s13 = int_to_ptr.vmem [resolvable:$true] %s16_s13 }
   0x3   :  { %p125_p1 = scmp.lt.u32.totalorder %s121_s16, %s227_s0 }
   0x5   :  { %p127_p2 = pnand %p125_p1, %p122_p0 }
   0x7   :  { %130 = shalt.err (!%p127_p2)
}
   0x8   :  { %s131_s21 = scalar_lea.vmem %s17_s13, 128  ;;  %p136_p4 = scmp.lt.s32.totalorder %s17_s13, %s17_s13 }
   0x9   :  { %p132_p3 = scmp.ne.s32.totalorder %s17_s13, %s131_s21  ;;  %p137_p5 = scmp.lt.s32.totalorder %s131_s21, %s131_s21 }
   0xb   :  { %p138_p6 = por %p137_p5, %p136_p4 }
   0xd   :  { %p139_p7 = pnand %p138_p6, %p132_p3 }
   0xf   :  { %142 = shalt.err (!%p139_p7)
}
  0x10   :  { %s170_s22 = smov 64   ;;  %s171_s23 = smov 4  }
  0x11   :  { %22 = dma.hbm_to_vmem [thread:$0]  %s227_s0, 128, %s17_s13, [#allocation5], %s170_s22, %s170_s22, %s171_s23  }
  0x12   :  { %165 = dma.done.wait [#allocation5], 128  }
  0x13   :  { %166 = vsyncadd [#allocation5], 4294967168  ;;  %vm39_vm0 = vcmask 60416   ;;  %v36_v0 = vld [vmem:[#allocation4] sm:$0xf]  ;;  %vm34_vm1 = vcmask 25600   ;;  %v48_v5 = vlaneseq  ;;  %v80_v20 = vstv %s229_s2 }
  0x14   :  { %v37_v1 = vld [vmem:[#allocation4 + $0x4] sm:$0xf]  ;;  %v40_v2 = vsel %vm39_vm0, %v36_v0, 0.0  ;;  %v172_v4 = vmov 0.0   ;;  %vm58_vm2 = vcmask 1041409   ;;  %s173_s29 = smov [#allocation7]  }
  0x15   :  { %41 = vadd.xlane.f32.xlu0 %v40_v2  ;;  %v43_v3 = vsel %vm39_vm0, %v37_v1, 0.0  ;;  %35 = vst.msk [vmem:[#allocation2] sm:$0x3] %vm34_vm1, %v172_v4  ;;  %v49_v6 = vand.u32 127, %v48_v5  ;;  %v51_v7 = vshrl.u32 %v48_v5, 7  ;;  %s102_s30 = sshll.u32 %s173_s29, 4  ;;  %s103_s30 = int_to_ptr.vmem [resolvable:$true] %s102_s30 }
  0x16   :  { %v111_v16 = vld [vmem:[%s228_s1] ss:$0 sm:$0xff]  ;;  %vm94_vm3 = vcmask 8192   ;;  %s143_s1 = scalar_lea.vmem %s103_s30, 16  ;;  %s147_s4 = scalar_lea.vmem %s103_s30, 32 }
  0x17   :  { %v52_v9 = vsub.s32 %v49_v6, %v51_v7  ;;  %p144_p8 = scmp.ne.s32.totalorder %s103_s30, %s143_s1  ;;  %p148_p9 = scmp.lt.s32.totalorder %s103_s30, %s103_s30 }
  0x18   :  { %p149_p10 = scmp.lt.s32.totalorder %s147_s4, %s143_s1 }
  0x19   :  { %44 = vadd.xlane.f32.xlu0 %v43_v3 }
  0x1a   :  { %p150_p11 = por %p149_p10, %p148_p9 }
  0x1c   :  { %v38_v13 = vld [vmem:[#allocation2] sm:$0x3]  ;;  %p151_p12 = pnand %p150_p11, %p144_p8 }
  0xa2   :  { %v42_v8 = vpop.xlane.xlu0 %41 }
  0xa3   :  { %v53_v11 = vrot.slane %v42_v8, %v52_v9 }
  0xa6   :  { %v45_v10 = vpop.xlane.xlu0 %44 }
  0xa7   :  { %v57_v12 = vrot.slane %v45_v10, %v52_v9 }
  0xa9   :  { %v59_v14 = vsel %vm58_vm2, %v57_v12, %v53_v11 }
  0xaa   :  { %v61_v15 = vadd.f32 %v59_v14, %v38_v13 }
  0xac   :  { %63 = vst.msk [vmem:[#allocation2] sm:$0x3] %vm34_vm1, %v61_v15 }
  0xb3   :  { %v67_v17 = vld [vmem:[#allocation2] sm:$0x3] }
  0xb4   :  { %v75_v18 = vmul.f32 %v111_v16, %v67_v17 }
  0xb6   :  { %v76_v19 = vsel %vm34_vm1, %v75_v18, 0.0 }
  0xb7   :  { %77 = vadd.xlane.f32.xlu1 %v76_v19 }
 0x144   :  { %v78_v21 = vpop.xlane.xlu1 %77 }
 0x145   :  { %v81_v22 = vadd.f32 %v80_v20, %v78_v21 }
 0x147   :  { %v82_v23 = vsub.f32 0.0, %v81_v22 }
 0x149   :  { %v83_v24 = vmul.f32 1.442695, %v82_v23 }
 0x14b   :  { %117 = vpow2.f32 %v83_v24 }
 0x155   :  { %v118_v25 = vpop.eup %117 }
 0x156   :  { %v85_v26 = vadd.f32 1.0, %v118_v25 }
 0x158   :  { %119 = vrcp.f32 %v85_v26 }
 0x162   :  { %v120_v27 = vpop.eup %119 }
 0x163   :  { %v92_v28 = vrot.slane %v120_v27, %v52_v9 }
 0x165   :  { %95 = vst.msk [vmem:[#allocation7] sm:$0x1] %vm94_vm3, %v92_v28 }
 0x166   :  { %154 = shalt.err (!%p151_p12)
}
 0x167   :  { %s155_s6 = scalar_lea.hbm %s230_s3, 16 }
 0x168   :  { %p156_p13 = scmp.ne.s32.totalorder %s230_s3, %s155_s6  ;;  %p159_p0 = scmp.lt.u32.totalorder %s155_s6, %s230_s3 }
 0x16a   :  { %p161_p1 = pnand %p159_p0, %p156_p13 }
 0x16c   :  { %164 = shalt.err (!%p161_p1)
}
 0x16d   :  { %105 = dma.vmem_to_hbm [thread:$0]  %s103_s30, 16, %s230_s3, [#allocation6]  }
 0x16e   :  { %167 = dma.done.wait [#allocation6], 16  }
 0x16f   :  { %168 = vsyncadd [#allocation6], 4294967280 }
 0x170   :  { %109 = vsyncpa [#allocation5], 1 }
 0x171   :  { %110 = vsyncpa [#allocation6], 1 }

</bundles_post_ra>
